<compile_context>
chip_gen: v7x
topology: tpu7x:2x2x1
jax: 0.10.0
libtpu: 0.0.40
codegen_flags: <defaults>
</compile_context>

<pallas_src>
import functools

import jax
import jax.numpy as jnp
from jax.experimental import pallas as pl
from jax.experimental.pallas import tpu as pltpu

_LANE = 128      # lane width of a vreg (last dim)
_SUBLANE = 8     # sublane count of an f32 vreg (second-to-last dim)


def _round_up(n, m):
    return ((n + m - 1) // m) * m


def _mlp_fused_kernel(x_ref, w_ref, b_ref, o_ref, *, n_layers):
    """Fused forward pass for one batch tile.

    x_ref: (TB, D) f32   padded input activations (one batch tile)
    w_ref: (L, D, D) bf16 padded, stacked layer weights
    b_ref: (L, 1, D) f32  padded, stacked layer biases
    o_ref: (TB, D) f32    padded output slab (lane-dense store)
    """
    act = x_ref[...].astype(jnp.float32)           # lives in vregs, not VMEM
    for j in range(n_layers):                      # short fixed loop -> unroll
        # bf16 x bf16 MXU matmul with f32 accumulation; bias add on VPU,
        # tanh on EUP, all in f32.
        y = jnp.dot(act.astype(w_ref.dtype), w_ref[j],
                    preferred_element_type=jnp.float32)
        y = y + b_ref[j]                           # (TB, D) + (1, D) broadcast
        if j < n_layers - 1:                       # last layer = Identity
            y = jnp.tanh(y)
        act = y
    o_ref[...] = act.astype(o_ref.dtype)


def mlp_forward_fused(x, w_stack, b_stack, *, out_dim):
    """Run the whole padded MLP in one pallas_call and slice the real output.

    x:        (B, K)  f32   unpadded input
    w_stack:  (L, D, D) bf16 zero-padded stacked weights (D multiple of 128)
    b_stack:  (L, 1, D) f32  zero-padded stacked biases
    """
    B, K = x.shape
    L, D, _ = w_stack.shape

    Bp = _round_up(max(B, _SUBLANE), _SUBLANE)
    # Gate the batch grid on size: tiny batches -> single program (no per-step
    # overhead); big batches -> tile the batch dim so megacore / the 2nd TC on
    # v7x can pick up parallel work while weights stay VMEM-resident.
    if Bp >= 512:
        tb = 256
        Bp = _round_up(Bp, tb)
    else:
        tb = Bp
    n_b = Bp // tb

    # Zero-pad the input once (fused with the kernel under jit).
    x_pad = jnp.zeros((Bp, D), jnp.float32).at[:B, :K].set(x)

    kernel = functools.partial(_mlp_fused_kernel, n_layers=L)
    out_pad = pl.pallas_call(
        kernel,
        out_shape=jax.ShapeDtypeStruct((Bp, D), jnp.float32),
        grid=(n_b,),
        in_specs=[
            pl.BlockSpec((tb, D), lambda i: (i, 0)),
            pl.BlockSpec((L, D, D), lambda i: (0, 0, 0)),   # weights resident
            pl.BlockSpec((L, 1, D), lambda i: (0, 0, 0)),
        ],
        out_specs=pl.BlockSpec((tb, D), lambda i: (i, 0)),
        compiler_params=pltpu.CompilerParams(
            dimension_semantics=("parallel",)),
    )(x_pad, w_stack, b_stack)

    return out_pad[:B, :out_dim]


# jit-fuse pad + kernel + slice into one dispatch.
_mlp_forward_jit = jax.jit(mlp_forward_fused, static_argnames=("out_dim",))


class MLP:
    """Mirrors the PyTorch MLP: Linear->Tanh repeated, last Linear->Identity."""

    def __init__(self, sizes, key):
        self.sizes = list(sizes)
        self.out_dim = sizes[-1]
        self.params = []                       # unpadded f32 (w, b), reference
        for j in range(len(sizes) - 1):
            fan_in, fan_out = sizes[j], sizes[j + 1]
            key, kw, kb = jax.random.split(key, 3)
            bound = 1.0 / jnp.sqrt(jnp.float32(fan_in))
            # PyTorch nn.Linear default init: U(-1/sqrt(fan_in), 1/sqrt(fan_in))
            w = jax.random.uniform(kw, (fan_in, fan_out), jnp.float32,
                                   minval=-bound, maxval=bound)
            b = jax.random.uniform(kb, (fan_out,), jnp.float32,
                                   minval=-bound, maxval=bound)
            self.params.append((w, b))
        self.n_layers = len(self.params)

        # Pad every layer to a common lane-dense width D (multiple of 128)
        # once, at construction time, and stack so the fused kernel gets one
        # weight tensor (bf16) and one bias tensor (f32).
        D = _round_up(max(self.sizes), _LANE)
        self.padded_dim = D
        w_stack, b_stack = [], []
        for (w, b), fan_in, fan_out in zip(self.params, sizes[:-1], sizes[1:]):
            w_pad = jnp.zeros((D, D), jnp.float32).at[:fan_in, :fan_out].set(w)
            b_pad = jnp.zeros((1, D), jnp.float32).at[0, :fan_out].set(b)
            w_stack.append(w_pad)
            b_stack.append(b_pad)
        self.w_stack = jnp.stack(w_stack).astype(jnp.bfloat16)   # (L, D, D) bf16
        self.b_stack = jnp.stack(b_stack).reshape(
            self.n_layers, 1, D).astype(jnp.float32)             # (L, 1, D) f32

    def __call__(self, x):
        return _mlp_forward_jit(x, self.w_stack, self.b_stack,
                                out_dim=self.out_dim)


def mlp_reference(x, params):
    for j, (w, b) in enumerate(params):
        x = x @ w + b
        if j < len(params) - 1:
            x = jnp.tanh(x)
    return x


if __name__ == "__main__":
    key = jax.random.PRNGKey(0)
    key, xkey, pkey = jax.random.split(key, 3)

    # e.g. a policy MLP: obs_dim=4 -> hidden 32, 32 -> n_actions=2
    sizes = [4, 32, 32, 2]
    batch = 2

    x = jax.random.normal(xkey, (batch, sizes[0]), jnp.float32)

    mlp = MLP(sizes, pkey)
    out = mlp(x)
    out = jax.block_until_ready(out)

    # f32 reference with the original (unquantized) weights; tolerance loosened
    # because the kernel runs the matmuls with bf16 weights/activations.
    ref = mlp_reference(x, mlp.params)
    assert out.shape == (batch, sizes[-1])
    assert jnp.allclose(out, ref, atol=2e-2, rtol=2e-2), (
        jnp.max(jnp.abs(out - ref)))

    print("KERNEL_OK")
</pallas_src>

<mosaic_0001>
module attributes {stable_mosaic.version = 11 : i64} {
  func.func @_mlp_fused_kernel(%arg0: i32, %arg1: memref<8x128xf32, #tpu.memory_space<vmem>>, %arg2: memref<3x128x128xbf16, #tpu.memory_space<vmem>>, %arg3: memref<3x1x128xf32, #tpu.memory_space<vmem>>, %arg4: memref<8x128xf32, #tpu.memory_space<vmem>>) attributes {dimension_semantics = [#tpu.dimension_semantics<parallel>], iteration_bounds = array<i64: 1>, scalar_prefetch = 0 : i64, scratch_operands = 0 : i64, tpu.core_type = #tpu.core_type<tc>, window_params = [{transform_indices = @transform_0, window_bounds = array<i64: 8, 128>}, {pipeline_mode = #tpu.pipeline_mode<synchronous>, transform_indices = @transform_1, window_bounds = array<i64: 3, 128, 128>}, {pipeline_mode = #tpu.pipeline_mode<synchronous>, transform_indices = @transform_2, window_bounds = array<i64: 3, 1, 128>}, {transform_indices = @transform_3, window_bounds = array<i64: 8, 128>}]} {
    %c0 = arith.constant 0 : index
    %c0_0 = arith.constant 0 : index
    %0 = vector.load %arg1[%c0, %c0_0] : memref<8x128xf32, #tpu.memory_space<vmem>>, vector<8x128xf32>
    %1 = arith.truncf %0 : vector<8x128xf32> to vector<8x128xbf16>
    %c0_1 = arith.constant 0 : index
    %c0_2 = arith.constant 0 : index
    %c0_3 = arith.constant 0 : index
    %2 = vector.load %arg2[%c0_1, %c0_2, %c0_3] : memref<3x128x128xbf16, #tpu.memory_space<vmem>>, vector<1x128x128xbf16>
    %3 = vector.shape_cast %2 : vector<1x128x128xbf16> to vector<128x128xbf16>
    %cst = arith.constant dense<0.000000e+00> : vector<8x128xf32>
    %4 = tpu.matmul %1, %3, %cst {dimension_numbers = #tpu.dot_dimension_numbers<[1], [0], [0], [1], [0, 0, 1, 1], [], []>} : vector<8x128xbf16>, vector<128x128xbf16>, vector<8x128xf32> -> vector<8x128xf32>
    %c0_4 = arith.constant 0 : index
    %c0_5 = arith.constant 0 : index
    %c0_6 = arith.constant 0 : index
    %5 = vector.load %arg3[%c0_4, %c0_5, %c0_6] : memref<3x1x128xf32, #tpu.memory_space<vmem>>, vector<1x1x128xf32>
    %6 = vector.shape_cast %5 : vector<1x1x128xf32> to vector<1x128xf32>
    %7 = vector.broadcast %6 : vector<1x128xf32> to vector<8x128xf32>
    %8 = arith.addf %4, %7 : vector<8x128xf32>
    %9 = math.tanh %8 : vector<8x128xf32>
    %10 = arith.truncf %9 : vector<8x128xf32> to vector<8x128xbf16>
    %c1 = arith.constant 1 : index
    %c0_7 = arith.constant 0 : index
    %c0_8 = arith.constant 0 : index
    %11 = vector.load %arg2[%c1, %c0_7, %c0_8] : memref<3x128x128xbf16, #tpu.memory_space<vmem>>, vector<1x128x128xbf16>
    %12 = vector.shape_cast %11 : vector<1x128x128xbf16> to vector<128x128xbf16>
    %cst_9 = arith.constant dense<0.000000e+00> : vector<8x128xf32>
    %13 = tpu.matmul %10, %12, %cst_9 {dimension_numbers = #tpu.dot_dimension_numbers<[1], [0], [0], [1], [0, 0, 1, 1], [], []>} : vector<8x128xbf16>, vector<128x128xbf16>, vector<8x128xf32> -> vector<8x128xf32>
    %c1_10 = arith.constant 1 : index
    %c0_11 = arith.constant 0 : index
    %c0_12 = arith.constant 0 : index
    %14 = vector.load %arg3[%c1_10, %c0_11, %c0_12] : memref<3x1x128xf32, #tpu.memory_space<vmem>>, vector<1x1x128xf32>
    %15 = vector.shape_cast %14 : vector<1x1x128xf32> to vector<1x128xf32>
    %16 = vector.broadcast %15 : vector<1x128xf32> to vector<8x128xf32>
    %17 = arith.addf %13, %16 : vector<8x128xf32>
    %18 = math.tanh %17 : vector<8x128xf32>
    %19 = arith.truncf %18 : vector<8x128xf32> to vector<8x128xbf16>
    %c2 = arith.constant 2 : index
    %c0_13 = arith.constant 0 : index
    %c0_14 = arith.constant 0 : index
    %20 = vector.load %arg2[%c2, %c0_13, %c0_14] : memref<3x128x128xbf16, #tpu.memory_space<vmem>>, vector<1x128x128xbf16>
    %21 = vector.shape_cast %20 : vector<1x128x128xbf16> to vector<128x128xbf16>
    %cst_15 = arith.constant dense<0.000000e+00> : vector<8x128xf32>
    %22 = tpu.matmul %19, %21, %cst_15 {dimension_numbers = #tpu.dot_dimension_numbers<[1], [0], [0], [1], [0, 0, 1, 1], [], []>} : vector<8x128xbf16>, vector<128x128xbf16>, vector<8x128xf32> -> vector<8x128xf32>
    %c2_16 = arith.constant 2 : index
    %c0_17 = arith.constant 0 : index
    %c0_18 = arith.constant 0 : index
    %23 = vector.load %arg3[%c2_16, %c0_17, %c0_18] : memref<3x1x128xf32, #tpu.memory_space<vmem>>, vector<1x1x128xf32>
    %24 = vector.shape_cast %23 : vector<1x1x128xf32> to vector<1x128xf32>
    %25 = vector.broadcast %24 : vector<1x128xf32> to vector<8x128xf32>
    %26 = arith.addf %22, %25 : vector<8x128xf32>
    %c0_19 = arith.constant 0 : index
    %c0_20 = arith.constant 0 : index
    %27 = vector.load %arg4[%c0_19, %c0_20] : memref<8x128xf32, #tpu.memory_space<vmem>>, vector<8x128xf32>
    tpu.vector_store %arg4[%c0_19, %c0_20], %26 {strides = array<i32>} : memref<8x128xf32, #tpu.memory_space<vmem>>, vector<8x128xf32>,
    return
  }
  func.func @transform_0(%arg0: i32) -> (i32, i32) {
    %c0_i32 = arith.constant 0 : i32
    %c0_i32_0 = arith.constant 0 : i32
    return %arg0, %c0_i32 : i32, i32
  }
  func.func @transform_1(%arg0: i32) -> (i32, i32, i32) {
    %c0_i32 = arith.constant 0 : i32
    %c0_i32_0 = arith.constant 0 : i32
    %c0_i32_1 = arith.constant 0 : i32
    %c0_i32_2 = arith.constant 0 : i32
    return %c0_i32, %c0_i32_0, %c0_i32_1 : i32, i32, i32
  }
  func.func @transform_2(%arg0: i32) -> (i32, i32, i32) {
    %c0_i32 = arith.constant 0 : i32
    %c0_i32_0 = arith.constant 0 : i32
    %c0_i32_1 = arith.constant 0 : i32
    %c0_i32_2 = arith.constant 0 : i32
    return %c0_i32, %c0_i32_0, %c0_i32_1 : i32, i32, i32
  }
  func.func @transform_3(%arg0: i32) -> (i32, i32) {
    %c0_i32 = arith.constant 0 : i32
    %c0_i32_0 = arith.constant 0 : i32
    return %arg0, %c0_i32 : i32, i32
  }
}

</mosaic_0001>

<bundles_post_ra>
// kernel: mlp_forward_fused.1
= control target key start
LH: loop header
LB: loop body
LE: loop exit
PB: predicated region body
PF: predicated region fallthrough
CT: control target
= control target key end

     0   :  { %8 = vsyncpa [#allocation3], 0  ;;  %s551_s12 = smov [#allocation2]   ;;  %s633_s0 = inlined_call_operand.vmem [shape: f32[8,128], index: 0, kind: input, shape index: {}]   ;;  %s634_s1 = inlined_call_operand.hbm [shape: bf16[3,128,128], index: 1, kind: input, shape index: {}]   ;;  %s635_s2 = inlined_call_operand.vmem [shape: f32[3,1,128], index: 2, kind: input, shape index: {}]   ;;  %s636_s3 = inlined_call_operand.vmem [shape: f32[8,128], index: 3, kind: output, shape index: {}]  }
   0x1   :  { %s16_s13 = sshll.u32 %s551_s12, 4  ;;  %s527_s16 = scalar_lea.hbm %s634_s1, 3072  ;;  %s17_s13 = int_to_ptr.vmem [resolvable:$true] %s16_s13 }
   0x2   :  { %p528_p0 = scmp.ne.s32.totalorder %s634_s1, %s527_s16  ;;  %p531_p1 = scmp.lt.u32.totalorder %s527_s16, %s634_s1 }
   0x4   :  { %p533_p2 = pnand %p531_p1, %p528_p0 }
   0x6   :  { %536 = shalt.err (!%p533_p2)
}
   0x7   :  { %s537_s21 = scalar_lea.vmem %s17_s13, 3072  ;;  %p542_p4 = scmp.lt.s32.totalorder %s17_s13, %s17_s13 }
   0x8   :  { %p538_p3 = scmp.ne.s32.totalorder %s17_s13, %s537_s21  ;;  %p543_p5 = scmp.lt.s32.totalorder %s537_s21, %s537_s21 }
   0xa   :  { %p544_p6 = por %p543_p5, %p542_p4 }
   0xc   :  { %p545_p7 = pnand %p544_p6, %p538_p3 }
   0xe   :  { %548 = shalt.err (!%p545_p7)
}
   0xf   :  { %s552_s22 = smov 64   ;;  %s553_s23 = smov 4  }
  0x10   :  { %22 = dma.hbm_to_vmem [thread:$0]  %s634_s1, 3072, %s17_s13, [#allocation3], %s552_s22, %s552_s22, %s553_s23  }
  0x11   :  { %549 = dma.done.wait [#allocation3], 3072  }
  0x12   :  { %550 = vsyncadd [#allocation3], 4294964224  ;;  %v554_v0 = vmov 0.0   ;;  %vm555_vm0 = vmmov 0   ;;  %v499_v1 = vld [vmem:[#allocation2] sm:$0xff]   ;;  %v500_v2 = vld [vmem:[#allocation2 + $0x8] sm:$0xff]  }
  0x13   :  { %434 = vmatprep.subr.bf16.mxu0 %v554_v0  ;;  %450 = vmatprep.mubr.msk.bf16.mxu0 %vm555_vm0, %v554_v0  ;;  %v501_v3 = vld [vmem:[#allocation2 + $0x10] sm:$0xff]   ;;  %v507_v4 = vld [vmem:[#allocation2 + $0x40] sm:$0xff]   ;;  %v502_v5 = vld [vmem:[#allocation2 + $0x18] sm:$0xff]  }
  0x14   :  { %454 = vmatprep.subr.bf16.mxu1 %v554_v0  ;;  %470 = vmatprep.mubr.msk.bf16.mxu1 %vm555_vm0, %v554_v0  ;;  %v508_v6 = vld [vmem:[#allocation2 + $0x48] sm:$0xff]   ;;  %v503_v7 = vld [vmem:[#allocation2 + $0x20] sm:$0xff]   ;;  %v509_v8 = vld [vmem:[#allocation2 + $0x50] sm:$0xff]  }
  0x15   :  { %435 = vmatpush3.bf16.msra.mxu0 %v499_v1  ;;  %455 = vmatpush3.bf16.msra.mxu1 %v507_v4  ;;  %v504_v9 = vld [vmem:[#allocation2 + $0x28] sm:$0xff]   ;;  %v510_v10 = vld [vmem:[#allocation2 + $0x58] sm:$0xff]   ;;  %v505_v11 = vld [vmem:[#allocation2 + $0x30] sm:$0xff]  }
  0x16   :  { %436 = vmatprep.subr.bf16.mxu0 %v554_v0  ;;  %456 = vmatprep.subr.bf16.mxu1 %v554_v0  ;;  %v506_v12 = vld [vmem:[#allocation2 + $0x38] sm:$0xff]   ;;  %v29_v13 = vld [vmem:[%s633_s0] sm:$0xff]  ;;  %v512_v16 = vld [vmem:[#allocation2 + $0x68] sm:$0xff]  }
  0x17   :  { %v30_v14 = vpack.c.bf16 %v29_v13, %v29_v13  ;;  %v511_v15 = vld [vmem:[#allocation2 + $0x60] sm:$0xff]   ;;  %v513_v17 = vld [vmem:[#allocation2 + $0x70] sm:$0xff]   ;;  %v514_v18 = vld [vmem:[#allocation2 + $0x78] sm:$0xff]  }
  0x18   :  { %v515_v19 = vld [vmem:[#allocation2 + $0x80] sm:$0xff]   ;;  %v516_v20 = vld [vmem:[#allocation2 + $0x88] sm:$0xff]   ;;  %v517_v21 = vld [vmem:[#allocation2 + $0x90] sm:$0xff]  }
  0x19   :  { %437 = vmatpush3.bf16.msra.mxu0 %v500_v2  ;;  %457 = vmatpush3.bf16.msra.mxu1 %v508_v6  ;;  %v518_v22 = vld [vmem:[#allocation2 + $0x98] sm:$0xff]   ;;  %v378_v23 = vld [vmem:[%s635_s2] ss:$0 sm:$0xff]  ;;  %v520_v32 = vld [vmem:[#allocation2 + $0xa8] sm:$0xff]  }
  0x1a   :  { %438 = vmatprep.subr.bf16.mxu0 %v554_v0  ;;  %458 = vmatprep.subr.bf16.mxu1 %v554_v0  ;;  %v519_v31 = vld [vmem:[#allocation2 + $0xa0] sm:$0xff]   ;;  %v521_v33 = vld [vmem:[#allocation2 + $0xb0] sm:$0xff]   ;;  %v522_v34 = vld [vmem:[#allocation2 + $0xb8] sm:$0xff]  }
  0x1b   :  { %v388_v35 = vld [vmem:[%s635_s2 + $0x1] ss:$0 sm:$0xff]  ;;  %v398_v43 = vld [vmem:[%s635_s2 + $0x2] ss:$0 sm:$0xff] }
  0x1d   :  { %439 = vmatpush3.bf16.msra.mxu0 %v501_v3  ;;  %459 = vmatpush3.bf16.msra.mxu1 %v509_v8 }
  0x1e   :  { %440 = vmatprep.subr.bf16.mxu0 %v554_v0  ;;  %460 = vmatprep.subr.bf16.mxu1 %v554_v0 }
  0x21   :  { %441 = vmatpush3.bf16.msra.mxu0 %v502_v5  ;;  %461 = vmatpush3.bf16.msra.mxu1 %v510_v10 }
  0x22   :  { %442 = vmatprep.subr.bf16.mxu0 %v554_v0  ;;  %462 = vmatprep.subr.bf16.mxu1 %v554_v0 }
  0x25   :  { %443 = vmatpush3.bf16.msra.mxu0 %v503_v7  ;;  %463 = vmatpush3.bf16.msra.mxu1 %v511_v15 }
  0x26   :  { %444 = vmatprep.subr.bf16.mxu0 %v554_v0  ;;  %464 = vmatprep.subr.bf16.mxu1 %v554_v0 }
  0x29   :  { %445 = vmatpush3.bf16.msra.mxu0 %v504_v9  ;;  %465 = vmatpush3.bf16.msra.mxu1 %v512_v16 }
  0x2a   :  { %446 = vmatprep.subr.bf16.mxu0 %v554_v0  ;;  %466 = vmatprep.subr.bf16.mxu1 %v554_v0 }
  0x2d   :  { %447 = vmatpush3.bf16.msra.mxu0 %v505_v11  ;;  %467 = vmatpush3.bf16.msra.mxu1 %v513_v17 }
  0x2e   :  { %448 = vmatprep.subr.bf16.mxu0 %v554_v0  ;;  %468 = vmatprep.subr.bf16.mxu1 %v554_v0 }
  0x31   :  { %449 = vmatpush3.bf16.msra.mxu0 %v506_v12  ;;  %469 = vmatpush3.bf16.msra.mxu1 %v514_v18 }
  0x32   :  { %474 = vmatprep.subr.bf16.mxu0 %v554_v0 }
  0x34   :  { %451 = vmatmul.mubr.bf16.vlgmr.msra.gmra.mrb[0].mxu0 %v30_v14 }
  0x35   :  { %490 = vmatprep.mubr.msk.bf16.mxu0 %vm555_vm0, %v554_v0  ;;  %475 = vmatpush3.bf16.msra.mxu0 %v515_v19 }
  0x36   :  { %476 = vmatprep.subr.bf16.mxu0 %v554_v0 }
  0x39   :  { %477 = vmatpush3.bf16.msra.mxu0 %v516_v20 }
  0x3a   :  { %478 = vmatprep.subr.bf16.mxu0 %v554_v0 }
  0x3d   :  { %479 = vmatpush3.bf16.msra.mxu0 %v517_v21 }
  0x3e   :  { %480 = vmatprep.subr.bf16.mxu0 %v554_v0 }
  0x41   :  { %481 = vmatpush3.bf16.msra.mxu0 %v518_v22 }
  0x42   :  { %482 = vmatprep.subr.bf16.mxu0 %v554_v0 }
  0x45   :  { %483 = vmatpush3.bf16.msra.mxu0 %v519_v31 }
  0x46   :  { %484 = vmatprep.subr.bf16.mxu0 %v554_v0 }
  0x49   :  { %485 = vmatpush3.bf16.msra.mxu0 %v520_v32 }
  0x4a   :  { %486 = vmatprep.subr.bf16.mxu0 %v554_v0 }
  0x4d   :  { %487 = vmatpush3.bf16.msra.mxu0 %v521_v33 }
  0x4e   :  { %488 = vmatprep.subr.bf16.mxu0 %v554_v0 }
  0x51   :  { %489 = vmatpush3.bf16.msra.mxu0 %v522_v34 }
 0x107   :  { %v136_v24 = vpop.f32.mrb[0].mxu0 }
 0x108   :  { %v137_v25 = vadd.f32 %v378_v23, %v136_v24  ;;  %v452_v26 = vpop.f32.mrb[1].mxu0 }
 0x109   :  { %v139_v27 = vpop.f32.mrb[2].mxu0 }
 0x10a   :  { %523 = vtanh.f32 %v137_v25  ;;  %v453_v28 = vpop.f32.mrb[3].mxu0 }
 0x114   :  { %v524_v29 = vpop.eup %523 }
 0x115   :  { %v143_v30 = vpack.c.bf16 %v524_v29, %v524_v29 }
 0x117   :  { %471 = vmatmul.mubr.bf16.vlgmr.msra.gmra.mrb[0].mxu1 %v143_v30 }
 0x1ea   :  { %v251_v36 = vpop.f32.mrb[0].mxu1 }
 0x1eb   :  { %v252_v37 = vadd.f32 %v388_v35, %v251_v36  ;;  %v472_v38 = vpop.f32.mrb[1].mxu1 }
 0x1ec   :  { %v254_v39 = vpop.f32.mrb[2].mxu1 }
 0x1ed   :  { %525 = vtanh.f32 %v252_v37  ;;  %v473_v40 = vpop.f32.mrb[3].mxu1 }
 0x1f7   :  { %v526_v41 = vpop.eup %525 }
 0x1f8   :  { %v258_v42 = vpack.c.bf16 %v526_v41, %v526_v41 }
 0x1fa   :  { %491 = vmatmul.mubr.bf16.vlgmr.msra.gmra.mrb[4].mxu0 %v258_v42 }
 0x2cd   :  { %v366_v44 = vpop.f32.mrb[4].mxu0 }
 0x2ce   :  { %v367_v45 = vadd.f32 %v398_v43, %v366_v44  ;;  %v492_v46 = vpop.f32.mrb[5].mxu0 }
 0x2cf   :  { %v369_v47 = vpop.f32.mrb[6].mxu0 }
 0x2d0   :  { %372 = vst [vmem:[%s636_s3] sm:$0xff] %v367_v45  ;;  %v493_v48 = vpop.f32.mrb[7].mxu0 }
 0x2d1   :  { %377 = vsyncpa [#allocation3], 1 }

</bundles_post_ra>
